<compile_context>
chip_gen: v7x
topology: tpu7x:2x2x1
jax: 0.10.0
libtpu: 0.0.40
codegen_flags: <defaults>
</compile_context>

<pallas_src>
import jax
import jax.numpy as jnp
from jax import lax
from jax.experimental import pallas as pl
from jax.experimental.pallas import tpu as pltpu


def cnn_kernel(params_ref, wmask_ref, lw_ref, x_ref, out_ref):
    # params_ref: SMEM (5,) = [w1_center, b1, w2_center', b2', lin_bias]  (BN folded into conv2)
    # wmask_ref:  VMEM (4, 128) rows = [w1_left*mask_r, w1_right*mask_l,
    #                                   w2_left'*mask_r, w2_right'*mask_l]
    # lw_ref:     VMEM (1, 128) linear weight
    # x_ref:      VMEM (TB, 128) input tile
    # out_ref:    VMEM (1, TB)  lane-dense output row
    x = x_ref[...]
    L = x.shape[1]
    wm = wmask_ref[...]  # (4, 128)

    def conv3(v, left_row, w_center, right_row, bias):
        # out[l] = w_left*v[l-1] + w_center*v[l] + w_right*v[l+1] + b  (zero padding)
        left = pltpu.roll(v, shift=1, axis=1) * left_row        # mask zeroes col 0
        right = pltpu.roll(v, shift=L - 1, axis=1) * right_row  # mask zeroes col L-1
        return left + w_center * v + right + bias

    # conv1 + ReLU
    h = jnp.maximum(conv3(x, wm[0:1], params_ref[0], wm[1:2], params_ref[1]), 0.0)

    # dropout(p=0.1): identity in eval mode

    # conv2 with BatchNorm1d (eval, running stats) folded into weights/bias, then ReLU
    h = jnp.maximum(conv3(h, wm[2:3], params_ref[2], wm[3:4], params_ref[3]), 0.0)

    # Linear(128 -> 1), lane-dense: contract lanes of (1,128) x (TB,128) -> (1, TB)
    out_ref[...] = (
        lax.dot_general(lw_ref[...], h, (((1,), (1,)), ((), ())),
                        preferred_element_type=jnp.float32)
        + params_ref[4]
    )


def _fold_params(c1w, c1b, c2w, c2b, gamma, beta, rmean, rvar, lin_b, eps=1e-5):
    """Host-side: fold eval-mode BN into conv2, fold edge weights into (1,128) masks."""
    scale = gamma * lax.rsqrt(rvar + eps)            # (1,)
    w2f = c2w * scale                                # (3,)
    b2f = (c2b - rmean) * scale + beta               # (1,)

    mask_r = jnp.ones((128,), jnp.float32).at[0].set(0.0)     # zero at col 0
    mask_l = jnp.ones((128,), jnp.float32).at[127].set(0.0)   # zero at col 127

    wmasks = jnp.stack([
        c1w[0] * mask_r, c1w[2] * mask_l,
        w2f[0] * mask_r, w2f[2] * mask_l,
    ]).astype(jnp.float32)                           # (4, 128)

    scalars = jnp.array([c1w[1], c1b[0], w2f[1], b2f[0], lin_b[0]], dtype=jnp.float32)  # (5,)
    return scalars, wmasks


def cnn_classifier_forward(x, c1w, c1b, c2w, c2b, gamma, beta, rmean, rvar,
                           lin_w, lin_b, *, tb=256):
    """x: (B, 1, 128) float32 (NCL, like PyTorch). Returns (B, 1) float32."""
    B, C, L = x.shape
    assert C == 1 and L == 128
    assert tb % 128 == 0

    scalars, wmasks = _fold_params(c1w, c1b, c2w, c2b, gamma, beta, rmean, rvar, lin_b)

    x2 = x.reshape(B, L).astype(jnp.float32)
    grid = pl.cdiv(B, tb)
    b_pad = grid * tb
    if b_pad != B:
        x2 = jnp.pad(x2, ((0, b_pad - B), (0, 0)))   # padded rows are independent garbage, sliced off

    out = pl.pallas_call(
        cnn_kernel,
        out_shape=jax.ShapeDtypeStruct((1, b_pad), jnp.float32),
        grid=(grid,),
        in_specs=[
            pl.BlockSpec(memory_space=pltpu.MemorySpace.SMEM),   # scalar params (5,)
            pl.BlockSpec((4, 128), lambda i: (0, 0)),            # weight*mask rows (resident)
            pl.BlockSpec((1, 128), lambda i: (0, 0)),            # linear weight   (resident)
            pl.BlockSpec((tb, 128), lambda i: (i, 0)),           # x batch tile
        ],
        out_specs=pl.BlockSpec((1, tb), lambda i: (0, i)),       # lane-dense output row
        compiler_params=pltpu.CompilerParams(
            dimension_semantics=("parallel",)),                  # v7x: shard batch across 2 TCs
    )(scalars, wmasks, lin_w.astype(jnp.float32), x2)

    return out.reshape(b_pad, 1)[:B]


def reference_forward(x, c1w, c1b, c2w, c2b, gamma, beta, rmean, rvar, lin_w, lin_b):
    """Pure-JAX reference mirroring the PyTorch forward (eval mode)."""
    B, C, L = x.shape
    h = x.reshape(B, L)

    def conv1d(v, w, b):
        vm1 = jnp.pad(v[:, :-1], ((0, 0), (1, 0)))
        vp1 = jnp.pad(v[:, 1:], ((0, 0), (0, 1)))
        return w[0] * vm1 + w[1] * v + w[2] * vp1 + b[0]

    h = jnp.maximum(conv1d(h, c1w, c1b), 0.0)
    h = conv1d(h, c2w, c2b)
    h = (h - rmean[0]) / jnp.sqrt(rvar[0] + 1e-5) * gamma[0] + beta[0]
    h = jnp.maximum(h, 0.0)
    return h @ lin_w.T + lin_b[0]


if __name__ == "__main__":
    key = jax.random.PRNGKey(0)
    k_x, k_c1, k_b1, k_c2, k_b2, k_lw, k_lb = jax.random.split(key, 7)

    B, L = 2, 128
    x = jax.random.normal(k_x, (B, 1, L), dtype=jnp.float32)

    # Conv1d(1,1,3) params (~PyTorch-scale init: U(-1/sqrt(3), 1/sqrt(3)))
    bound = 1.0 / jnp.sqrt(3.0)
    c1w = jax.random.uniform(k_c1, (3,), minval=-bound, maxval=bound).astype(jnp.float32)
    c1b = jax.random.uniform(k_b1, (1,), minval=-bound, maxval=bound).astype(jnp.float32)
    c2w = jax.random.uniform(k_c2, (3,), minval=-bound, maxval=bound).astype(jnp.float32)
    c2b = jax.random.uniform(k_b2, (1,), minval=-bound, maxval=bound).astype(jnp.float32)

    # BatchNorm1d(1): non-trivial affine/running stats to exercise the host-side folding
    gamma = jnp.array([1.3], jnp.float32)
    beta = jnp.array([-0.2], jnp.float32)
    rmean = jnp.array([0.05], jnp.float32)
    rvar = jnp.array([0.9], jnp.float32)

    # Linear(128 -> 1), U(-1/sqrt(128), 1/sqrt(128))
    lbound = 1.0 / jnp.sqrt(128.0)
    lin_w = jax.random.uniform(k_lw, (1, 128), minval=-lbound, maxval=lbound).astype(jnp.float32)
    lin_b = jax.random.uniform(k_lb, (1,), minval=-lbound, maxval=lbound).astype(jnp.float32)

    out = cnn_classifier_forward(x, c1w, c1b, c2w, c2b, gamma, beta, rmean, rvar, lin_w, lin_b)
    out = jax.block_until_ready(out)

    ref = reference_forward(x, c1w, c1b, c2w, c2b, gamma, beta, rmean, rvar, lin_w, lin_b)
    assert out.shape == (B, 1)
    assert jnp.allclose(out, ref, atol=1e-4, rtol=1e-4), (out, ref)

    print("KERNEL_OK")
</pallas_src>

<mosaic_0001>
module attributes {stable_mosaic.version = 11 : i64} {
  func.func @cnn_kernel(%arg0: i32, %arg1: memref<5xf32, #tpu.memory_space<smem>>, %arg2: memref<4x128xf32, #tpu.memory_space<vmem>>, %arg3: memref<1x128xf32, #tpu.memory_space<vmem>>, %arg4: memref<256x128xf32, #tpu.memory_space<vmem>>, %arg5: memref<1x256xf32, #tpu.memory_space<vmem>>) attributes {dimension_semantics = [#tpu.dimension_semantics<parallel>], iteration_bounds = array<i64: 1>, scalar_prefetch = 0 : i64, scratch_operands = 0 : i64, tpu.core_type = #tpu.core_type<tc>, window_params = [{transform_indices = @transform_0, window_bounds = array<i64: 5>}, {pipeline_mode = #tpu.pipeline_mode<synchronous>, transform_indices = @transform_1, window_bounds = array<i64: 4, 128>}, {pipeline_mode = #tpu.pipeline_mode<synchronous>, transform_indices = @transform_2, window_bounds = array<i64: 1, 128>}, {transform_indices = @transform_3, window_bounds = array<i64: 256, 128>}, {transform_indices = @transform_4, window_bounds = array<i64: 1, 256>}]} {
    %c0 = arith.constant 0 : index
    %c0_0 = arith.constant 0 : index
    %0 = vector.load %arg4[%c0, %c0_0] : memref<256x128xf32, #tpu.memory_space<vmem>>, vector<256x128xf32>
    %c0_1 = arith.constant 0 : index
    %c0_2 = arith.constant 0 : index
    %1 = vector.load %arg2[%c0_1, %c0_2] : memref<4x128xf32, #tpu.memory_space<vmem>>, vector<4x128xf32>
    %2 = vector.extract_strided_slice %1 {offsets = [0, 0], sizes = [1, 128], strides = [1, 1]} : vector<4x128xf32> to vector<1x128xf32>
    %c0_3 = arith.constant 0 : index
    %3 = memref.load %arg1[%c0_3] : memref<5xf32, #tpu.memory_space<smem>>
    %4 = vector.extract_strided_slice %1 {offsets = [1, 0], sizes = [1, 128], strides = [1, 1]} : vector<4x128xf32> to vector<1x128xf32>
    %c1 = arith.constant 1 : index
    %5 = memref.load %arg1[%c1] : memref<5xf32, #tpu.memory_space<smem>>
    %c1_i32 = arith.constant 1 : i32
    %6 = tpu.dynamic_rotate %0 by %c1_i32 dim 1 : vector<256x128xf32>, i32 -> vector<256x128xf32>
    %7 = vector.broadcast %2 : vector<1x128xf32> to vector<256x128xf32>
    %8 = arith.mulf %6, %7 : vector<256x128xf32>
    %c127_i32 = arith.constant 127 : i32
    %9 = tpu.dynamic_rotate %0 by %c127_i32 dim 1 : vector<256x128xf32>, i32 -> vector<256x128xf32>
    %10 = vector.broadcast %4 : vector<1x128xf32> to vector<256x128xf32>
    %11 = arith.mulf %9, %10 : vector<256x128xf32>
    %12 = vector.broadcast %3 : f32 to vector<256x128xf32>
    %13 = arith.mulf %12, %0 : vector<256x128xf32>
    %14 = arith.addf %8, %13 : vector<256x128xf32>
    %15 = arith.addf %14, %11 : vector<256x128xf32>
    %16 = vector.broadcast %5 : f32 to vector<256x128xf32>
    %17 = arith.addf %15, %16 : vector<256x128xf32>
    %cst = arith.constant 0.000000e+00 : f32
    %18 = vector.broadcast %cst : f32 to vector<256x128xf32>
    %19 = arith.maximumf %17, %18 : vector<256x128xf32>
    %20 = vector.extract_strided_slice %1 {offsets = [2, 0], sizes = [1, 128], strides = [1, 1]} : vector<4x128xf32> to vector<1x128xf32>
    %c2 = arith.constant 2 : index
    %21 = memref.load %arg1[%c2] : memref<5xf32, #tpu.memory_space<smem>>
    %22 = vector.extract_strided_slice %1 {offsets = [3, 0], sizes = [1, 128], strides = [1, 1]} : vector<4x128xf32> to vector<1x128xf32>
    %c3 = arith.constant 3 : index
    %23 = memref.load %arg1[%c3] : memref<5xf32, #tpu.memory_space<smem>>
    %c1_i32_4 = arith.constant 1 : i32
    %24 = tpu.dynamic_rotate %19 by %c1_i32_4 dim 1 : vector<256x128xf32>, i32 -> vector<256x128xf32>
    %25 = vector.broadcast %20 : vector<1x128xf32> to vector<256x128xf32>
    %26 = arith.mulf %24, %25 : vector<256x128xf32>
    %c127_i32_5 = arith.constant 127 : i32
    %27 = tpu.dynamic_rotate %19 by %c127_i32_5 dim 1 : vector<256x128xf32>, i32 -> vector<256x128xf32>
    %28 = vector.broadcast %22 : vector<1x128xf32> to vector<256x128xf32>
    %29 = arith.mulf %27, %28 : vector<256x128xf32>
    %30 = vector.broadcast %21 : f32 to vector<256x128xf32>
    %31 = arith.mulf %30, %19 : vector<256x128xf32>
    %32 = arith.addf %26, %31 : vector<256x128xf32>
    %33 = arith.addf %32, %29 : vector<256x128xf32>
    %34 = vector.broadcast %23 : f32 to vector<256x128xf32>
    %35 = arith.addf %33, %34 : vector<256x128xf32>
    %cst_6 = arith.constant 0.000000e+00 : f32
    %36 = vector.broadcast %cst_6 : f32 to vector<256x128xf32>
    %37 = arith.maximumf %35, %36 : vector<256x128xf32>
    %c0_7 = arith.constant 0 : index
    %c0_8 = arith.constant 0 : index
    %38 = vector.load %arg3[%c0_7, %c0_8] : memref<1x128xf32, #tpu.memory_space<vmem>>, vector<1x128xf32>
    %cst_9 = arith.constant dense<0.000000e+00> : vector<1x256xf32>
    %39 = tpu.matmul %38, %37, %cst_9 {dimension_numbers = #tpu.dot_dimension_numbers<[1], [1], [0], [0], [0, 0, 1, 0], [], []>} : vector<1x128xf32>, vector<256x128xf32>, vector<1x256xf32> -> vector<1x256xf32>
    %c4 = arith.constant 4 : index
    %40 = memref.load %arg1[%c4] : memref<5xf32, #tpu.memory_space<smem>>
    %41 = vector.broadcast %40 : f32 to vector<1x256xf32>
    %42 = arith.addf %39, %41 : vector<1x256xf32>
    %c0_10 = arith.constant 0 : index
    %c0_11 = arith.constant 0 : index
    %43 = vector.load %arg5[%c0_10, %c0_11] : memref<1x256xf32, #tpu.memory_space<vmem>>, vector<1x256xf32>
    tpu.vector_store %arg5[%c0_10, %c0_11], %42 {strides = array<i32>} : memref<1x256xf32, #tpu.memory_space<vmem>>, vector<1x256xf32>,
    return
  }
  func.func @transform_0(%arg0: i32) -> i32 {
    %c0_i32 = arith.constant 0 : i32
    %c0_i32_0 = arith.constant 0 : i32
    return %c0_i32 : i32
  }
  func.func @transform_1(%arg0: i32) -> (i32, i32) {
    %c0_i32 = arith.constant 0 : i32
    %c0_i32_0 = arith.constant 0 : i32
    %c0_i32_1 = arith.constant 0 : i32
    return %c0_i32, %c0_i32_0 : i32, i32
  }
  func.func @transform_2(%arg0: i32) -> (i32, i32) {
    %c0_i32 = arith.constant 0 : i32
    %c0_i32_0 = arith.constant 0 : i32
    %c0_i32_1 = arith.constant 0 : i32
    return %c0_i32, %c0_i32_0 : i32, i32
  }
  func.func @transform_3(%arg0: i32) -> (i32, i32) {
    %c0_i32 = arith.constant 0 : i32
    %c0_i32_0 = arith.constant 0 : i32
    return %arg0, %c0_i32 : i32, i32
  }
  func.func @transform_4(%arg0: i32) -> (i32, i32) {
    %c0_i32 = arith.constant 0 : i32
    %c0_i32_0 = arith.constant 0 : i32
    return %c0_i32, %arg0 : i32, i32
  }
}

</mosaic_0001>

<bundles_post_ra>
// kernel: tpu_custom_call.1
= control target key start
LH: loop header
LB: loop body
LE: loop exit
PB: predicated region body
PF: predicated region fallthrough
CT: control target
= control target key end

     0   :  { %9 = vsyncpa [#allocation5], 0  ;;  %s1913_s0 = inlined_call_operand.hbm [shape: f32[5], index: 0, kind: input, shape index: {}]   ;;  %s1914_s1 = inlined_call_operand.hbm [shape: f32[4,128], index: 1, kind: input, shape index: {}]   ;;  %s1915_s2 = inlined_call_operand.vmem [shape: f32[1,128], index: 2, kind: input, shape index: {}]   ;;  %s1916_s3 = inlined_call_operand.hbm [shape: f32[256,128], index: 3, kind: input, shape index: {}]   ;;  %s1917_s4 = inlined_call_operand.hbm [shape: f32[1,256], index: 4, kind: output, shape index: {}]  }
   0x1   :  { %10 = vsyncpa [#allocation3], 0 }
   0x2   :  { %11 = vsyncpa [#allocation8], 0 }
   0x3   :  { %12 = vsyncpa [#allocation4], 0  ;;  %s1009_s17 = scalar_lea.hbm %s1913_s0, 16 }
   0x4   :  { %p1010_p0 = scmp.ne.s32.totalorder %s1913_s0, %s1009_s17  ;;  %p1013_p1 = scmp.lt.u32.totalorder %s1009_s17, %s1913_s0 }
   0x6   :  { %p1015_p2 = pnand %p1013_p1, %p1010_p0 }
   0x8   :  { %1018 = shalt.err (!%p1015_p2)
}
   0x9   :  { %s1093_s22 = smov [#allocation2]   ;;  %s1094_s25 = smov [#allocation6]  }
   0xa   :  { %20 = dma.hbm_to_smem %s1913_s0, 16, %s1093_s22, [#allocation5]  }
   0xb   :  { %s27_s26 = sshll.u32 %s1094_s25, 4  ;;  %s1095_s27 = smov [#allocation7]   ;;  %s28_s26 = int_to_ptr.vmem [resolvable:$true] %s27_s26 }
   0xc   :  { %s38_s28 = sshll.u32 %s1095_s27, 4  ;;  %s1019_s5 = scalar_lea.hbm %s1914_s1, 64  ;;  %s39_s28 = int_to_ptr.vmem [resolvable:$true] %s38_s28 }
   0xd   :  { %p1020_p3 = scmp.ne.s32.totalorder %s1914_s1, %s1019_s5  ;;  %p1023_p4 = scmp.lt.u32.totalorder %s1019_s5, %s1914_s1 }
   0xf   :  { %p1025_p5 = pnand %p1023_p4, %p1020_p3 }
  0x11   :  { %1028 = shalt.err (!%p1025_p5)
}
  0x12   :  { %s1029_s0 = scalar_lea.vmem %s28_s26, 64  ;;  %p1034_p7 = scmp.lt.s32.totalorder %s28_s26, %s28_s26 }
  0x13   :  { %p1030_p6 = scmp.ne.s32.totalorder %s28_s26, %s1029_s0  ;;  %p1035_p8 = scmp.lt.s32.totalorder %s1029_s0, %s1029_s0 }
  0x15   :  { %p1036_p9 = por %p1035_p8, %p1034_p7 }
  0x17   :  { %p1037_p10 = pnand %p1036_p9, %p1030_p6 }
  0x19   :  { %1040 = shalt.err (!%p1037_p10)
}
  0x1a   :  { %30 = dma.hbm_to_vmem [thread:$0]  %s1914_s1, 64, %s28_s26, [#allocation3]  }
  0x1b   :  { %s1041_s14 = scalar_lea.hbm %s1916_s3, 4096 }
  0x1c   :  { %p1042_p11 = scmp.ne.s32.totalorder %s1916_s3, %s1041_s14  ;;  %p1045_p12 = scmp.lt.u32.totalorder %s1041_s14, %s1916_s3 }
  0x1e   :  { %p1047_p13 = pnand %p1045_p12, %p1042_p11 }
  0x20   :  { %1050 = shalt.err (!%p1047_p13)
}
  0x21   :  { %s1051_s19 = scalar_lea.vmem %s39_s28, 4096  ;;  %p1056_p1 = scmp.lt.s32.totalorder %s39_s28, %s39_s28 }
  0x22   :  { %p1052_p0 = scmp.ne.s32.totalorder %s39_s28, %s1051_s19  ;;  %p1057_p2 = scmp.lt.s32.totalorder %s1051_s19, %s1051_s19 }
  0x24   :  { %p1058_p3 = por %p1057_p2, %p1056_p1 }
  0x26   :  { %p1059_p4 = pnand %p1058_p3, %p1052_p0 }
  0x28   :  { %1062 = shalt.err (!%p1059_p4)
}
  0x29   :  { %s1096_s1 = smov 128   ;;  %s1097_s20 = smov 8  }
  0x2a   :  { %44 = dma.hbm_to_vmem [thread:$0]  %s1916_s3, 4096, %s39_s28, [#allocation8], %s1096_s1, %s1096_s1, %s1097_s20  }
  0x2b   :  { %1085 = dma.done.wait [#allocation5], 16  }
  0x2c   :  { %1086 = vsyncadd [#allocation5], 4294967280 }
  0x2d   :  { %1087 = dma.done.wait [#allocation3], 64  }
  0x2e   :  { %1088 = vsyncadd [#allocation3], 4294967232 }
  0x2f   :  { %1089 = dma.done.wait [#allocation8], 4096  }
  0x30   :  { %1090 = vsyncadd [#allocation8], 4294963200 }
  0x31   :  { %54 = sfence }
  0x32   :  { %v1163_v0 = vld [vmem:[#allocation7 + $0x80] sm:$0xff]  ;;  %s1098_s23 = smov 1   ;;  %s88_s24 = sld [smem:[#allocation2]]  ;;  %v1171_v2 = vld [vmem:[#allocation7 + $0x88] sm:$0xff]  ;;  %v1195_v9 = vld [vmem:[#allocation7 + $0x90] sm:$0xff]  ;;  %v154_v31 = vlaneseq }
  0x33   :  { %v1165_v1 = vld [vmem:[#allocation7] sm:$0xff]  ;;  %122 = vrot.lane.b32.xlu0 %v1163_v0, %s1098_s23  ;;  %v1173_v3 = vld [vmem:[#allocation7 + $0x8] sm:$0xff]  ;;  %s1099_s3 = smov 127   ;;  %v1197_v10 = vld [vmem:[#allocation7 + $0x98] sm:$0xff]  ;;  %s930_s25 = sld [smem:[#allocation2 + $0x1]] }
  0x34   :  { %90 = vrot.lane.b32.xlu1 %v1165_v1, %s1098_s23  ;;  %v79_v5 = vld [vmem:[#allocation7 + $0xc0] sm:$0xff]  ;;  %v80_v6 = vld [vmem:[#allocation7 + $0xc8] sm:$0xff]  ;;  %v1203_v11 = vld [vmem:[#allocation7 + $0x10] sm:$0xff]  ;;  %v1328_v32 = vshrl.u32 %v154_v31, 7  ;;  %s931_s26 = sld [smem:[#allocation2 + $0x2]]  ;;  %s932_s27 = sld [smem:[#allocation2 + $0x3]] }
  0x35   :  { %v1205_v12 = vld [vmem:[#allocation7 + $0x18] sm:$0xff]  ;;  %v1219_v13 = vld [vmem:[#allocation7 + $0xa0] sm:$0xff]  ;;  %v1221_v14 = vld [vmem:[#allocation7 + $0xa8] sm:$0xff]  ;;  %s1101_s30 = smov [#allocation9]   ;;  %vm910_vm0 = vcmp.lt.s32.totalorder %v154_v31, 256 }
  0x36   :  { %v1227_v15 = vld [vmem:[#allocation7 + $0x20] sm:$0xff]  ;;  %v1229_v16 = vld [vmem:[#allocation7 + $0x28] sm:$0xff]  ;;  %v1243_v17 = vld [vmem:[#allocation7 + $0xb0] sm:$0xff]  ;;  %v156_v35 = vsub.s32 0, %v1328_v32  ;;  %v256_v42 = vsub.s32 1, %v1328_v32  ;;  %s919_s5 = sshll.u32 %s1101_s30, 4  ;;  %s920_s5 = int_to_ptr.vmem [resolvable:$true] %s919_s5 }
  0x37   :  { %124 = vrot.lane.b32.xlu0 %v1171_v2, %s1098_s23  ;;  %v1245_v18 = vld [vmem:[#allocation7 + $0xb8] sm:$0xff]  ;;  %v1251_v19 = vld [vmem:[#allocation7 + $0x30] sm:$0xff]  ;;  %v1269_v21 = vld [vmem:[#allocation7 + $0x40] sm:$0xff]  ;;  %s1063_s6 = scalar_lea.vmem %s920_s5, 32  ;;  %p1068_p6 = scmp.lt.s32.totalorder %s920_s5, %s920_s5 }
  0x38   :  { %92 = vrot.lane.b32.xlu1 %v1173_v3, %s1098_s23  ;;  %v1183_v4 = vstv %s88_s24  ;;  %v1253_v20 = vld [vmem:[#allocation7 + $0x38] sm:$0xff]  ;;  %v1271_v22 = vld [vmem:[#allocation7 + $0x48] sm:$0xff]  ;;  %v1283_v23 = vld [vmem:[#allocation7 + $0xd0] sm:$0xff]  ;;  %p1064_p5 = scmp.ne.s32.totalorder %s920_s5, %s1063_s6  ;;  %p1069_p7 = scmp.lt.s32.totalorder %s1063_s6, %s1063_s6 }
  0x39   :  { %v1186_v7 = vmul.f32 %v1183_v4, %v79_v5  ;;  %v1189_v8 = vmul.f32 %v1183_v4, %v80_v6  ;;  %v1285_v24 = vld [vmem:[#allocation7 + $0xd8] sm:$0xff]  ;;  %v1291_v25 = vld [vmem:[#allocation7 + $0x50] sm:$0xff]  ;;  %v1307_v27 = vld [vmem:[#allocation7 + $0xe0] sm:$0xff]  ;;  %v307_v43 = vmul.f32 %v1183_v4, %v1163_v0  ;;  %v308_v46 = vmul.f32 %v1183_v4, %v1171_v2 }
  0x3a   :  { %v1293_v26 = vld [vmem:[#allocation7 + $0x58] sm:$0xff]  ;;  %v1309_v28 = vld [vmem:[#allocation7 + $0xe8] sm:$0xff]  ;;  %v1315_v29 = vld [vmem:[#allocation7 + $0x60] sm:$0xff]  ;;  %v291_v50 = vmul.f32 %v1183_v4, %v1165_v1  ;;  %v292_v51 = vmul.f32 %v1183_v4, %v1173_v3  ;;  %v1382_v60 = vstv %s930_s25  ;;  %p1070_p8 = por %p1069_p7, %p1068_p6 }
  0x3b   :  { %222 = vrot.lane.b32.xlu0 %v1163_v0, %s1099_s3  ;;  %v1317_v30 = vld [vmem:[#allocation7 + $0x68] sm:$0xff]  ;;  %v1334_v33 = vld [vmem:[#allocation7 + $0xf0] sm:$0xff]  ;;  %v1336_v34 = vld [vmem:[#allocation7 + $0xf8] sm:$0xff] }
  0x3c   :  { %224 = vrot.lane.b32.xlu1 %v1171_v2, %s1099_s3  ;;  %v1343_v36 = vld [vmem:[#allocation6] sm:$0xf]  ;;  %v1345_v37 = vld [vmem:[#allocation7 + $0x70] sm:$0xff]  ;;  %p1071_p9 = pnand %p1070_p8, %p1064_p5 }
  0x3d   :  { %v1347_v38 = vld [vmem:[#allocation7 + $0x78] sm:$0xff]  ;;  %v1350_v41 = vrot.slane %v1343_v36, %v156_v35  ;;  %v1364_v49 = vrot.slane %v1343_v36, %v256_v42 }
  0x3f   :  { %190 = vrot.lane.b32.xlu0 %v1165_v1, %s1099_s3 }
  0x40   :  { %192 = vrot.lane.b32.xlu1 %v1173_v3, %s1099_s3 }
  0x43   :  { %126 = vrot.lane.b32.xlu0 %v1195_v9, %s1098_s23 }
  0x44   :  { %128 = vrot.lane.b32.xlu1 %v1197_v10, %s1098_s23 }
  0x47   :  { %94 = vrot.lane.b32.xlu0 %v1203_v11, %s1098_s23 }
  0x48   :  { %96 = vrot.lane.b32.xlu1 %v1205_v12, %s1098_s23 }
  0x4b   :  { %226 = vrot.lane.b32.xlu0 %v1195_v9, %s1099_s3 }
  0x4c   :  { %228 = vrot.lane.b32.xlu1 %v1197_v10, %s1099_s3 }
  0x4f   :  { %194 = vrot.lane.b32.xlu0 %v1203_v11, %s1099_s3 }
  0x50   :  { %196 = vrot.lane.b32.xlu1 %v1205_v12, %s1099_s3 }
  0x53   :  { %130 = vrot.lane.b32.xlu0 %v1219_v13, %s1098_s23 }
  0x54   :  { %132 = vrot.lane.b32.xlu1 %v1221_v14, %s1098_s23 }
  0x57   :  { %98 = vrot.lane.b32.xlu0 %v1227_v15, %s1098_s23 }
  0x58   :  { %100 = vrot.lane.b32.xlu1 %v1229_v16, %s1098_s23 }
  0x5b   :  { %230 = vrot.lane.b32.xlu0 %v1219_v13, %s1099_s3 }
  0x5c   :  { %232 = vrot.lane.b32.xlu1 %v1221_v14, %s1099_s3 }
  0x5f   :  { %198 = vrot.lane.b32.xlu0 %v1227_v15, %s1099_s3 }
  0x60   :  { %200 = vrot.lane.b32.xlu1 %v1229_v16, %s1099_s3 }
  0x63   :  { %134 = vrot.lane.b32.xlu0 %v1243_v17, %s1098_s23 }
  0x64   :  { %136 = vrot.lane.b32.xlu1 %v1245_v18, %s1098_s23 }
  0x67   :  { %102 = vrot.lane.b32.xlu0 %v1251_v19, %s1098_s23 }
  0x68   :  { %104 = vrot.lane.b32.xlu1 %v1253_v20, %s1098_s23 }
  0x6b   :  { %234 = vrot.lane.b32.xlu0 %v1243_v17, %s1099_s3 }
  0x6c   :  { %236 = vrot.lane.b32.xlu1 %v1245_v18, %s1099_s3 }
  0x6f   :  { %202 = vrot.lane.b32.xlu0 %v1251_v19, %s1099_s3 }
  0x70   :  { %204 = vrot.lane.b32.xlu1 %v1253_v20, %s1099_s3 }
  0x73   :  { %138 = vrot.lane.b32.xlu0 %v79_v5, %s1098_s23 }
  0x74   :  { %140 = vrot.lane.b32.xlu1 %v80_v6, %s1098_s23 }
  0x77   :  { %106 = vrot.lane.b32.xlu0 %v1269_v21, %s1098_s23 }
  0x78   :  { %108 = vrot.lane.b32.xlu1 %v1271_v22, %s1098_s23 }
  0x7b   :  { %238 = vrot.lane.b32.xlu0 %v79_v5, %s1099_s3 }
  0x7c   :  { %240 = vrot.lane.b32.xlu1 %v80_v6, %s1099_s3 }
  0x7f   :  { %206 = vrot.lane.b32.xlu0 %v1269_v21, %s1099_s3 }
  0x80   :  { %208 = vrot.lane.b32.xlu1 %v1271_v22, %s1099_s3 }
  0x83   :  { %142 = vrot.lane.b32.xlu0 %v1283_v23, %s1098_s23 }
  0x84   :  { %144 = vrot.lane.b32.xlu1 %v1285_v24, %s1098_s23 }
  0x87   :  { %110 = vrot.lane.b32.xlu0 %v1291_v25, %s1098_s23 }
  0x88   :  { %112 = vrot.lane.b32.xlu1 %v1293_v26, %s1098_s23 }
  0x8b   :  { %242 = vrot.lane.b32.xlu0 %v1283_v23, %s1099_s3 }
  0x8c   :  { %244 = vrot.lane.b32.xlu1 %v1285_v24, %s1099_s3 }
  0x8f   :  { %210 = vrot.lane.b32.xlu0 %v1291_v25, %s1099_s3 }
  0x90   :  { %212 = vrot.lane.b32.xlu1 %v1293_v26, %s1099_s3 }
  0x93   :  { %146 = vrot.lane.b32.xlu0 %v1307_v27, %s1098_s23 }
  0x94   :  { %148 = vrot.lane.b32.xlu1 %v1309_v28, %s1098_s23 }
  0x97   :  { %114 = vrot.lane.b32.xlu0 %v1315_v29, %s1098_s23 }
  0x98   :  { %116 = vrot.lane.b32.xlu1 %v1317_v30, %s1098_s23 }
  0x9b   :  { %246 = vrot.lane.b32.xlu0 %v1307_v27, %s1099_s3 }
  0x9c   :  { %248 = vrot.lane.b32.xlu1 %v1309_v28, %s1099_s3 }
  0x9f   :  { %214 = vrot.lane.b32.xlu0 %v1315_v29, %s1099_s3 }
  0xa0   :  { %216 = vrot.lane.b32.xlu1 %v1317_v30, %s1099_s3 }
  0xa3   :  { %150 = vrot.lane.b32.xlu0 %v1334_v33, %s1098_s23 }
  0xa4   :  { %152 = vrot.lane.b32.xlu1 %v1336_v34, %s1098_s23 }
  0xa5   :  { %v123_v39 = vpop.permute.xlu0 %122 }
  0xa6   :  { %v91_v40 = vpop.permute.xlu1 %90  ;;  %v174_v47 = vmul.f32 %v1350_v41, %v123_v39 }
  0xa7   :  { %118 = vrot.lane.b32.xlu0 %v1345_v37, %s1098_s23  ;;  %v158_v52 = vmul.f32 %v1350_v41, %v91_v40 }
  0xa8   :  { %120 = vrot.lane.b32.xlu1 %v1347_v38, %s1098_s23  ;;  %v339_v56 = vadd.f32 %v307_v43, %v174_v47 }
  0xa9   :  { %v125_v44 = vpop.permute.xlu0 %124  ;;  %v323_v63 = vadd.f32 %v291_v50, %v158_v52 }
  0xaa   :  { %v93_v45 = vpop.permute.xlu1 %92  ;;  %v175_v48 = vmul.f32 %v1350_v41, %v125_v44 }
  0xab   :  { %250 = vrot.lane.b32.xlu0 %v1334_v33, %s1099_s3  ;;  %v159_v53 = vmul.f32 %v1350_v41, %v93_v45 }
  0xac   :  { %252 = vrot.lane.b32.xlu1 %v1336_v34, %s1099_s3  ;;  %v340_v57 = vadd.f32 %v308_v46, %v175_v48 }
  0xad   :  { %v223_v54 = vpop.permute.xlu0 %222  ;;  %v324_v0 = vadd.f32 %v292_v51, %v159_v53  ;;  %v309_v53 = vmul.f32 %v1183_v4, %v1195_v9 }
  0xae   :  { %v225_v55 = vpop.permute.xlu1 %224  ;;  %v274_v58 = vmul.f32 %v1364_v49, %v223_v54  ;;  %v310_v54 = vmul.f32 %v1183_v4, %v1197_v10 }
  0xaf   :  { %v275_v59 = vmul.f32 %v1364_v49, %v225_v55  ;;  %218 = vrot.lane.b32.xlu0 %v1345_v37, %s1099_s3 }
  0xb0   :  { %220 = vrot.lane.b32.xlu1 %v1347_v38, %s1099_s3  ;;  %v371_v61 = vadd.f32 %v339_v56, %v274_v58  ;;  %v294_v58 = vmul.f32 %v1183_v4, %v1205_v12 }
  0xb1   :  { %v372_v62 = vadd.f32 %v340_v57, %v275_v59  ;;  %v191_v1 = vpop.permute.xlu0 %190  ;;  %v293_v57 = vmul.f32 %v1183_v4, %v1203_v11 }
  0xb2   :  { %v193_v2 = vpop.permute.xlu1 %192  ;;  %v258_v3 = vmul.f32 %v1364_v49, %v191_v1  ;;  %v404_v6 = vadd.f32 %v1382_v60, %v371_v61 }
  0xb3   :  { %v259_v5 = vmul.f32 %v1364_v49, %v193_v2  ;;  %v405_v35 = vadd.f32 %v1382_v60, %v372_v62 }
  0xb4   :  { %v355_v39 = vadd.f32 %v323_v63, %v258_v3  ;;  %v1388_v42 = vmax.f32 %v404_v6, 0.0 }
  0xb5   :  { %v356_v40 = vadd.f32 %v324_v0, %v259_v5  ;;  %v1390_v43 = vmax.f32 %v405_v35, 0.0  ;;  %v127_v44 = vpop.permute.xlu0 %126 }
  0xb6   :  { %v129_v45 = vpop.permute.xlu1 %128  ;;  %486 = vrot.lane.b32.xlu0 %v1388_v42, %s1098_s23  ;;  %v388_v47 = vadd.f32 %v1382_v60, %v355_v39  ;;  %v176_v55 = vmul.f32 %v1350_v41, %v127_v44 }
  0xb7   :  { %488 = vrot.lane.b32.xlu1 %v1390_v43, %s1098_s23  ;;  %v389_v46 = vadd.f32 %v1382_v60, %v356_v40  ;;  %v177_v56 = vmul.f32 %v1350_v41, %v129_v45 }
  0xb8   :  { %v1400_v52 = vmax.f32 %v388_v47, 0.0  ;;  %v341_v62 = vadd.f32 %v309_v53, %v176_v55 }
  0xb9   :  { %v1398_v48 = vmax.f32 %v389_v46, 0.0  ;;  %v95_v50 = vpop.permute.xlu0 %94  ;;  %v342_v63 = vadd.f32 %v310_v54, %v177_v56 }
  0xba   :  { %v97_v51 = vpop.permute.xlu1 %96  ;;  %454 = vrot.lane.b32.xlu0 %v1400_v52, %s1098_s23  ;;  %v160_v9 = vmul.f32 %v1350_v41, %v95_v50 }
  0xbb   :  { %456 = vrot.lane.b32.xlu1 %v1398_v48, %s1098_s23  ;;  %v161_v10 = vmul.f32 %v1350_v41, %v97_v51 }
  0xbc   :  { %v325_v2 = vadd.f32 %v293_v57, %v160_v9 }
  0xbd   :  { %v227_v59 = vpop.permute.xlu0 %226  ;;  %v326_v3 = vadd.f32 %v294_v58, %v161_v10  ;;  %v311_v10 = vmul.f32 %v1183_v4, %v1219_v13 }
  0xbe   :  { %v229_v61 = vpop.permute.xlu1 %228  ;;  %v276_v0 = vmul.f32 %v1364_v49, %v227_v59  ;;  %586 = vrot.lane.b32.xlu0 %v1388_v42, %s1099_s3  ;;  %v312_v59 = vmul.f32 %v1183_v4, %v1221_v14 }
  0xbf   :  { %v277_v1 = vmul.f32 %v1364_v49, %v229_v61  ;;  %588 = vrot.lane.b32.xlu1 %v1390_v43, %s1099_s3 }
  0xc0   :  { %v373_v11 = vadd.f32 %v341_v62, %v276_v0  ;;  %v296_v0 = vmul.f32 %v1183_v4, %v1229_v16 }
  0xc1   :  { %v374_v12 = vadd.f32 %v342_v63, %v277_v1  ;;  %v195_v5 = vpop.permute.xlu0 %194  ;;  %v295_v63 = vmul.f32 %v1183_v4, %v1227_v15 }
  0xc2   :  { %v197_v6 = vpop.permute.xlu1 %196  ;;  %v260_v35 = vmul.f32 %v1364_v49, %v195_v5  ;;  %v406_v44 = vadd.f32 %v1382_v60, %v373_v11  ;;  %554 = vrot.lane.b32.xlu0 %v1400_v52, %s1099_s3 }
  0xc3   :  { %v261_v39 = vmul.f32 %v1364_v49, %v197_v6  ;;  %556 = vrot.lane.b32.xlu1 %v1398_v48, %s1099_s3  ;;  %v407_v40 = vadd.f32 %v1382_v60, %v374_v12 }
  0xc4   :  { %v357_v45 = vadd.f32 %v325_v2, %v260_v35  ;;  %v1434_v50 = vmax.f32 %v406_v44, 0.0 }
  0xc5   :  { %v358_v46 = vadd.f32 %v326_v3, %v261_v39  ;;  %v1432_v47 = vmax.f32 %v407_v40, 0.0  ;;  %v131_v51 = vpop.permute.xlu0 %130 }
  0xc6   :  { %v133_v53 = vpop.permute.xlu1 %132  ;;  %v390_v55 = vadd.f32 %v1382_v60, %v357_v45  ;;  %490 = vrot.lane.b32.xlu0 %v1434_v50, %s1098_s23  ;;  %v178_v61 = vmul.f32 %v1350_v41, %v131_v51 }
  0xc7   :  { %492 = vrot.lane.b32.xlu1 %v1432_v47, %s1098_s23  ;;  %v391_v54 = vadd.f32 %v1382_v60, %v358_v46  ;;  %v179_v62 = vmul.f32 %v1350_v41, %v133_v53 }
  0xc8   :  { %v1444_v57 = vmax.f32 %v390_v55, 0.0  ;;  %v343_v12 = vadd.f32 %v311_v10, %v178_v61 }
  0xc9   :  { %v1442_v56 = vmax.f32 %v391_v54, 0.0  ;;  %v99_v58 = vpop.permute.xlu0 %98  ;;  %v344_v2 = vadd.f32 %v312_v59, %v179_v62 }
  0xca   :  { %v101_v9 = vpop.permute.xlu1 %100  ;;  %458 = vrot.lane.b32.xlu0 %v1444_v57, %s1098_s23  ;;  %v162_v13 = vmul.f32 %v1350_v41, %v99_v58 }
  0xcb   :  { %460 = vrot.lane.b32.xlu1 %v1442_v56, %s1098_s23  ;;  %v163_v14 = vmul.f32 %v1350_v41, %v101_v9 }
  0xcc   :  { %v327_v6 = vadd.f32 %v295_v63, %v162_v13 }
  0xcd   :  { %v231_v1 = vpop.permute.xlu0 %230  ;;  %v328_v35 = vadd.f32 %v296_v0, %v163_v14  ;;  %v313_v14 = vmul.f32 %v1183_v4, %v1243_v17 }
  0xce   :  { %v233_v11 = vpop.permute.xlu1 %232  ;;  %v278_v3 = vmul.f32 %v1364_v49, %v231_v1  ;;  %590 = vrot.lane.b32.xlu0 %v1434_v50, %s1099_s3  ;;  %v314_v1 = vmul.f32 %v1183_v4, %v1245_v18 }
  0xcf   :  { %v279_v5 = vmul.f32 %v1364_v49, %v233_v11  ;;  %592 = vrot.lane.b32.xlu1 %v1432_v47, %s1099_s3 }
  0xd0   :  { %v375_v15 = vadd.f32 %v343_v12, %v278_v3  ;;  %v298_v3 = vmul.f32 %v1183_v4, %v1253_v20 }
  0xd1   :  { %v376_v16 = vadd.f32 %v344_v2, %v279_v5  ;;  %v199_v39 = vpop.permute.xlu0 %198  ;;  %v297_v2 = vmul.f32 %v1183_v4, %v1251_v19 }
  0xd2   :  { %v201_v40 = vpop.permute.xlu1 %200  ;;  %v262_v44 = vmul.f32 %v1364_v49, %v199_v39  ;;  %v408_v51 = vadd.f32 %v1382_v60, %v375_v15  ;;  %558 = vrot.lane.b32.xlu0 %v1444_v57, %s1099_s3 }
  0xd3   :  { %v263_v45 = vmul.f32 %v1364_v49, %v201_v40  ;;  %560 = vrot.lane.b32.xlu1 %v1442_v56, %s1099_s3  ;;  %v409_v46 = vadd.f32 %v1382_v60, %v376_v16 }
  0xd4   :  { %v359_v53 = vadd.f32 %v327_v6, %v262_v44  ;;  %v1478_v58 = vmax.f32 %v408_v51, 0.0 }
  0xd5   :  { %v360_v54 = vadd.f32 %v328_v35, %v263_v45  ;;  %v1476_v55 = vmax.f32 %v409_v46, 0.0  ;;  %v135_v9 = vpop.permute.xlu0 %134 }
  0xd6   :  { %v137_v10 = vpop.permute.xlu1 %136  ;;  %v392_v61 = vadd.f32 %v1382_v60, %v359_v53  ;;  %494 = vrot.lane.b32.xlu0 %v1478_v58, %s1098_s23  ;;  %v180_v11 = vmul.f32 %v1350_v41, %v135_v9 }
  0xd7   :  { %496 = vrot.lane.b32.xlu1 %v1476_v55, %s1098_s23  ;;  %v393_v59 = vadd.f32 %v1382_v60, %v360_v54  ;;  %v181_v12 = vmul.f32 %v1350_v41, %v137_v10 }
  0xd8   :  { %v1488_v63 = vmax.f32 %v392_v61, 0.0  ;;  %v345_v16 = vadd.f32 %v313_v14, %v180_v11 }
  0xd9   :  { %v1486_v62 = vmax.f32 %v393_v59, 0.0  ;;  %v103_v0 = vpop.permute.xlu0 %102  ;;  %v346_v6 = vadd.f32 %v314_v1, %v181_v12 }
  0xda   :  { %v105_v13 = vpop.permute.xlu1 %104  ;;  %462 = vrot.lane.b32.xlu0 %v1488_v63, %s1098_s23  ;;  %v164_v17 = vmul.f32 %v1350_v41, %v103_v0 }
  0xdb   :  { %464 = vrot.lane.b32.xlu1 %v1486_v62, %s1098_s23  ;;  %v165_v18 = vmul.f32 %v1350_v41, %v105_v13 }
  0xdc   :  { %v329_v40 = vadd.f32 %v297_v2, %v164_v17 }
  0xdd   :  { %v235_v5 = vpop.permute.xlu0 %234  ;;  %v330_v44 = vadd.f32 %v298_v3, %v165_v18 }
  0xde   :  { %v237_v15 = vpop.permute.xlu1 %236  ;;  %v280_v35 = vmul.f32 %v1364_v49, %v235_v5  ;;  %594 = vrot.lane.b32.xlu0 %v1478_v58, %s1099_s3 }
  0xdf   :  { %v281_v39 = vmul.f32 %v1364_v49, %v237_v15  ;;  %596 = vrot.lane.b32.xlu1 %v1476_v55, %s1099_s3  ;;  %v299_v15 = vmul.f32 %v1183_v4, %v1269_v21 }
  0xe0   :  { %v377_v19 = vadd.f32 %v345_v16, %v280_v35  ;;  %v300_v16 = vmul.f32 %v1183_v4, %v1271_v22 }
  0xe1   :  { %v378_v20 = vadd.f32 %v346_v6, %v281_v39  ;;  %v203_v45 = vpop.permute.xlu0 %202 }
  0xe2   :  { %v205_v46 = vpop.permute.xlu1 %204  ;;  %v264_v51 = vmul.f32 %v1364_v49, %v203_v45  ;;  %v410_v9 = vadd.f32 %v1382_v60, %v377_v19  ;;  %562 = vrot.lane.b32.xlu0 %v1488_v63, %s1099_s3 }
  0xe3   :  { %v265_v53 = vmul.f32 %v1364_v49, %v205_v46  ;;  %564 = vrot.lane.b32.xlu1 %v1486_v62, %s1099_s3  ;;  %v411_v54 = vadd.f32 %v1382_v60, %v378_v20 }
  0xe4   :  { %v361_v10 = vadd.f32 %v329_v40, %v264_v51  ;;  %v1522_v0 = vmax.f32 %v410_v9, 0.0 }
  0xe5   :  { %v362_v59 = vadd.f32 %v330_v44, %v265_v53  ;;  %v1520_v61 = vmax.f32 %v411_v54, 0.0  ;;  %v139_v13 = vpop.permute.xlu0 %138 }
  0xe6   :  { %v141_v14 = vpop.permute.xlu1 %140  ;;  %v394_v11 = vadd.f32 %v1382_v60, %v361_v10  ;;  %498 = vrot.lane.b32.xlu0 %v1522_v0, %s1098_s23  ;;  %v182_v18 = vmul.f32 %v1350_v41, %v139_v13 }
  0xe7   :  { %500 = vrot.lane.b32.xlu1 %v1520_v61, %s1098_s23  ;;  %v395_v1 = vadd.f32 %v1382_v60, %v362_v59  ;;  %v183_v5 = vmul.f32 %v1350_v41, %v141_v14 }
  0xe8   :  { %v1532_v2 = vmax.f32 %v394_v11, 0.0  ;;  %v347_v20 = vadd.f32 %v1186_v7, %v182_v18 }
  0xe9   :  { %v1530_v12 = vmax.f32 %v395_v1, 0.0  ;;  %v107_v3 = vpop.permute.xlu0 %106  ;;  %v348_v40 = vadd.f32 %v1189_v8, %v183_v5 }
  0xea   :  { %v109_v17 = vpop.permute.xlu1 %108  ;;  %466 = vrot.lane.b32.xlu0 %v1532_v2, %s1098_s23  ;;  %v166_v6 = vmul.f32 %v1350_v41, %v107_v3 }
  0xeb   :  { %468 = vrot.lane.b32.xlu1 %v1530_v12, %s1098_s23  ;;  %v167_v35 = vmul.f32 %v1350_v41, %v109_v17 }
  0xec   :  { %v331_v46 = vadd.f32 %v299_v15, %v166_v6 }
  0xed   :  { %v239_v39 = vpop.permute.xlu0 %238  ;;  %v332_v51 = vadd.f32 %v300_v16, %v167_v35  ;;  %v317_v35 = vmul.f32 %v1183_v4, %v1283_v23 }
  0xee   :  { %v241_v19 = vpop.permute.xlu1 %240  ;;  %v282_v44 = vmul.f32 %v1364_v49, %v239_v39  ;;  %598 = vrot.lane.b32.xlu0 %v1522_v0, %s1099_s3  ;;  %v318_v39 = vmul.f32 %v1183_v4, %v1285_v24 }
  0xef   :  { %v283_v45 = vmul.f32 %v1364_v49, %v241_v19  ;;  %600 = vrot.lane.b32.xlu1 %v1520_v61, %s1099_s3 }
  0xf0   :  { %v379_v21 = vadd.f32 %v347_v20, %v282_v44  ;;  %v302_v44 = vmul.f32 %v1183_v4, %v1293_v26 }
  0xf1   :  { %v380_v22 = vadd.f32 %v348_v40, %v283_v45  ;;  %v207_v53 = vpop.permute.xlu0 %206  ;;  %v301_v40 = vmul.f32 %v1183_v4, %v1291_v25 }
  0xf2   :  { %v209_v54 = vpop.permute.xlu1 %208  ;;  %v266_v7 = vmul.f32 %v1364_v49, %v207_v53  ;;  %v412_v10 = vadd.f32 %v1382_v60, %v379_v21  ;;  %566 = vrot.lane.b32.xlu0 %v1532_v2, %s1099_s3 }
  0xf3   :  { %v267_v8 = vmul.f32 %v1364_v49, %v209_v54  ;;  %568 = vrot.lane.b32.xlu1 %v1530_v12, %s1099_s3  ;;  %v413_v9 = vadd.f32 %v1382_v60, %v380_v22 }
  0xf4   :  { %v363_v59 = vadd.f32 %v331_v46, %v266_v7  ;;  %v1564_v1 = vmax.f32 %v412_v10, 0.0 }
  0xf5   :  { %v364_v13 = vadd.f32 %v332_v51, %v267_v8  ;;  %v1562_v14 = vmax.f32 %v413_v9, 0.0  ;;  %v143_v11 = vpop.permute.xlu0 %142 }
  0xf6   :  { %v145_v3 = vpop.permute.xlu1 %144  ;;  %v396_v17 = vadd.f32 %v1382_v60, %v363_v59  ;;  %502 = vrot.lane.b32.xlu0 %v1564_v1, %s1098_s23  ;;  %v184_v19 = vmul.f32 %v1350_v41, %v143_v11 }
  0xf7   :  { %v397_v18 = vadd.f32 %v1382_v60, %v364_v13  ;;  %504 = vrot.lane.b32.xlu1 %v1562_v14, %s1098_s23  ;;  %v185_v20 = vmul.f32 %v1350_v41, %v145_v3 }
  0xf8   :  { %v1572_v5 = vmax.f32 %v396_v17, 0.0  ;;  %v349_v22 = vadd.f32 %v317_v35, %v184_v19 }
  0xf9   :  { %v1574_v15 = vmax.f32 %v397_v18, 0.0  ;;  %v111_v16 = vpop.permute.xlu0 %110  ;;  %v350_v46 = vadd.f32 %v318_v39, %v185_v20 }
  0xfa   :  { %v113_v6 = vpop.permute.xlu1 %112  ;;  %470 = vrot.lane.b32.xlu0 %v1572_v5, %s1098_s23  ;;  %v168_v23 = vmul.f32 %v1350_v41, %v111_v16 }
  0xfb   :  { %472 = vrot.lane.b32.xlu1 %v1574_v15, %s1098_s23  ;;  %v169_v24 = vmul.f32 %v1350_v41, %v113_v6 }
  0xfc   :  { %v333_v54 = vadd.f32 %v301_v40, %v168_v23 }
  0xfd   :  { %v243_v45 = vpop.permute.xlu0 %242  ;;  %v334_v7 = vadd.f32 %v302_v44, %v169_v24  ;;  %v319_v24 = vmul.f32 %v1183_v4, %v1307_v27 }
  0xfe   :  { %v245_v21 = vpop.permute.xlu1 %244  ;;  %v284_v51 = vmul.f32 %v1364_v49, %v243_v45  ;;  %602 = vrot.lane.b32.xlu0 %v1564_v1, %s1099_s3  ;;  %v320_v45 = vmul.f32 %v1183_v4, %v1309_v28 }
  0xff   :  { %v285_v53 = vmul.f32 %v1364_v49, %v245_v21  ;;  %604 = vrot.lane.b32.xlu1 %v1562_v14, %s1099_s3 }
 0x100   :  { %v381_v25 = vadd.f32 %v349_v22, %v284_v51  ;;  %v304_v51 = vmul.f32 %v1183_v4, %v1317_v30 }
 0x101   :  { %v382_v26 = vadd.f32 %v350_v46, %v285_v53  ;;  %v211_v8 = vpop.permute.xlu0 %210  ;;  %v303_v46 = vmul.f32 %v1183_v4, %v1315_v29 }
 0x102   :  { %v213_v9 = vpop.permute.xlu1 %212  ;;  %v414_v10 = vadd.f32 %v1382_v60, %v381_v25  ;;  %v268_v13 = vmul.f32 %v1364_v49, %v211_v8  ;;  %570 = vrot.lane.b32.xlu0 %v1572_v5, %s1099_s3 }
 0x103   :  { %v415_v59 = vadd.f32 %v1382_v60, %v382_v26  ;;  %v269_v11 = vmul.f32 %v1364_v49, %v213_v9  ;;  %572 = vrot.lane.b32.xlu1 %v1574_v15, %s1099_s3 }
 0x104   :  { %v1606_v3 = vmax.f32 %v414_v10, 0.0  ;;  %v365_v18 = vadd.f32 %v333_v54, %v268_v13 }
 0x105   :  { %v1608_v17 = vmax.f32 %v415_v59, 0.0  ;;  %v366_v16 = vadd.f32 %v334_v7, %v269_v11  ;;  %v147_v6 = vpop.permute.xlu0 %146 }
 0x106   :  { %v149_v35 = vpop.permute.xlu1 %148  ;;  %v398_v39 = vadd.f32 %v1382_v60, %v365_v18  ;;  %506 = vrot.lane.b32.xlu0 %v1606_v3, %s1098_s23  ;;  %v186_v21 = vmul.f32 %v1350_v41, %v147_v6 }
 0x107   :  { %v399_v19 = vadd.f32 %v1382_v60, %v366_v16  ;;  %508 = vrot.lane.b32.xlu1 %v1608_v17, %s1098_s23  ;;  %v187_v22 = vmul.f32 %v1350_v41, %v149_v35 }
 0x108   :  { %v1616_v20 = vmax.f32 %v398_v39, 0.0  ;;  %v351_v26 = vadd.f32 %v319_v24, %v186_v21 }
 0x109   :  { %v1618_v40 = vmax.f32 %v399_v19, 0.0  ;;  %v115_v44 = vpop.permute.xlu0 %114  ;;  %v352_v54 = vadd.f32 %v320_v45, %v187_v22 }
 0x10a   :  { %v117_v23 = vpop.permute.xlu1 %116  ;;  %474 = vrot.lane.b32.xlu0 %v1616_v20, %s1098_s23  ;;  %v170_v27 = vmul.f32 %v1350_v41, %v115_v44 }
 0x10b   :  { %476 = vrot.lane.b32.xlu1 %v1618_v40, %s1098_s23  ;;  %v171_v28 = vmul.f32 %v1350_v41, %v117_v23 }
 0x10c   :  { %v335_v9 = vadd.f32 %v303_v46, %v170_v27 }
 0x10d   :  { %v247_v53 = vpop.permute.xlu0 %246  ;;  %v336_v10 = vadd.f32 %v304_v51, %v171_v28  ;;  %v321_v28 = vmul.f32 %v1183_v4, %v1334_v33 }
 0x10e   :  { %v249_v25 = vpop.permute.xlu1 %248  ;;  %v286_v7 = vmul.f32 %v1364_v49, %v247_v53  ;;  %606 = vrot.lane.b32.xlu0 %v1606_v3, %s1099_s3  ;;  %v322_v53 = vmul.f32 %v1183_v4, %v1336_v34 }
 0x10f   :  { %v287_v8 = vmul.f32 %v1364_v49, %v249_v25  ;;  %608 = vrot.lane.b32.xlu1 %v1608_v17, %s1099_s3 }
 0x110   :  { %v383_v29 = vadd.f32 %v351_v26, %v286_v7  ;;  %v306_v7 = vmul.f32 %v1183_v4, %v1347_v38 }
 0x111   :  { %v384_v30 = vadd.f32 %v352_v54, %v287_v8  ;;  %v215_v59 = vpop.permute.xlu0 %214  ;;  %v305_v54 = vmul.f32 %v1183_v4, %v1345_v37 }
 0x112   :  { %v217_v13 = vpop.permute.xlu1 %216  ;;  %v416_v11 = vadd.f32 %v1382_v60, %v383_v29  ;;  %v270_v16 = vmul.f32 %v1364_v49, %v215_v59  ;;  %574 = vrot.lane.b32.xlu0 %v1616_v20, %s1099_s3 }
 0x113   :  { %v417_v18 = vadd.f32 %v1382_v60, %v384_v30  ;;  %v271_v6 = vmul.f32 %v1364_v49, %v217_v13  ;;  %576 = vrot.lane.b32.xlu1 %v1618_v40, %s1099_s3 }
 0x114   :  { %v1650_v35 = vmax.f32 %v416_v11, 0.0  ;;  %v367_v19 = vadd.f32 %v335_v9, %v270_v16 }
 0x115   :  { %v1652_v39 = vmax.f32 %v417_v18, 0.0  ;;  %v368_v44 = vadd.f32 %v336_v10, %v271_v6  ;;  %v151_v23 = vpop.permute.xlu0 %150 }
 0x116   :  { %v153_v24 = vpop.permute.xlu1 %152  ;;  %v400_v45 = vadd.f32 %v1382_v60, %v367_v19  ;;  %510 = vrot.lane.b32.xlu0 %v1650_v35, %s1098_s23  ;;  %v188_v25 = vmul.f32 %v1350_v41, %v151_v23 }
 0x117   :  { %v401_v21 = vadd.f32 %v1382_v60, %v368_v44  ;;  %512 = vrot.lane.b32.xlu1 %v1652_v39, %s1098_s23  ;;  %v189_v26 = vmul.f32 %v1350_v41, %v153_v24 }
 0x118   :  { %v1660_v22 = vmax.f32 %v400_v45, 0.0  ;;  %v353_v30 = vadd.f32 %v321_v28, %v188_v25 }
 0x119   :  { %v1662_v46 = vmax.f32 %v401_v21, 0.0  ;;  %v119_v51 = vpop.permute.xlu0 %118  ;;  %v354_v9 = vadd.f32 %v322_v53, %v189_v26  ;;  %v520_v21 = vsub.s32 2, %v1328_v32 }
 0x11a   :  { %v121_v27 = vpop.permute.xlu1 %120  ;;  %478 = vrot.lane.b32.xlu0 %v1660_v22, %s1098_s23  ;;  %v172_v33 = vmul.f32 %v1350_v41, %v119_v51 }
 0x11b   :  { %480 = vrot.lane.b32.xlu1 %v1662_v46, %s1098_s23  ;;  %v173_v34 = vmul.f32 %v1350_v41, %v121_v27  ;;  %v1710_v26 = vrot.slane %v1343_v36, %v520_v21 }
 0x11c   :  { %v337_v38 = vadd.f32 %v305_v54, %v172_v33  ;;  %v620_v54 = vsub.s32 3, %v1328_v32 }
 0x11d   :  { %v251_v8 = vpop.permute.xlu0 %250  ;;  %v338_v13 = vadd.f32 %v306_v7, %v173_v34 }
 0x11e   :  { %v253_v29 = vpop.permute.xlu1 %252  ;;  %v288_v10 = vmul.f32 %v1364_v49, %v251_v8  ;;  %610 = vrot.lane.b32.xlu0 %v1650_v35, %s1099_s3  ;;  %v1721_v8 = vrot.slane %v1343_v36, %v620_v54  ;;  %v1735_v36 = vld [vmem:[%s1915_s2] sm:$0x1]  ;;  %s933_s2 = sld [smem:[#allocation2 + $0x4]] }
 0x11f   :  { %v289_v59 = vmul.f32 %v1364_v49, %v253_v29  ;;  %612 = vrot.lane.b32.xlu1 %v1652_v39, %s1099_s3  ;;  %966 = vmatprep.mubr.f32.mxu0 %v1735_v36 }
 0x120   :  { %v385_v37 = vadd.f32 %v353_v30, %v288_v10 }
 0x121   :  { %v386_v4 = vadd.f32 %v354_v9, %v289_v59  ;;  %v219_v11 = vpop.permute.xlu0 %218 }
 0x122   :  { %v221_v41 = vpop.permute.xlu1 %220  ;;  %v418_v18 = vadd.f32 %v1382_v60, %v385_v37  ;;  %v272_v6 = vmul.f32 %v1364_v49, %v219_v11  ;;  %578 = vrot.lane.b32.xlu0 %v1660_v22, %s1099_s3 }
 0x123   :  { %v419_v16 = vadd.f32 %v1382_v60, %v386_v4  ;;  %v273_v19 = vmul.f32 %v1364_v49, %v221_v41  ;;  %580 = vrot.lane.b32.xlu1 %v1662_v46, %s1099_s3 }
 0x124   :  { %v1694_v44 = vmax.f32 %v418_v18, 0.0  ;;  %v369_v24 = vadd.f32 %v337_v38, %v272_v6 }
 0x125   :  { %v1696_v23 = vmax.f32 %v419_v16, 0.0  ;;  %v370_v45 = vadd.f32 %v338_v13, %v273_v19 }
 0x126   :  { %v402_v51 = vadd.f32 %v1382_v60, %v369_v24  ;;  %514 = vrot.lane.b32.xlu0 %v1694_v44, %s1098_s23 }
 0x127   :  { %v403_v27 = vadd.f32 %v1382_v60, %v370_v45  ;;  %516 = vrot.lane.b32.xlu1 %v1696_v23, %s1098_s23  ;;  %v1717_v60 = vstv %s931_s26 }
 0x128   :  { %v1705_v49 = vmax.f32 %v402_v51, 0.0  ;;  %v487_v53 = vpop.permute.xlu0 %486  ;;  %v672_v30 = vmul.f32 %v1717_v60, %v1390_v43  ;;  %v671_v9 = vmul.f32 %v1717_v60, %v1388_v42  ;;  %v1744_v42 = vstv %s932_s27 }
 0x129   :  { %v1707_v28 = vmax.f32 %v403_v27, 0.0  ;;  %v489_v25 = vpop.permute.xlu1 %488  ;;  %v538_v29 = vmul.f32 %v1710_v26, %v487_v53  ;;  %v656_v41 = vmul.f32 %v1717_v60, %v1398_v48  ;;  %v655_v16 = vmul.f32 %v1717_v60, %v1400_v52 }
 0x12a   :  { %482 = vrot.lane.b32.xlu0 %v1705_v49, %s1098_s23  ;;  %v539_v33 = vmul.f32 %v1710_v26, %v489_v25 }
 0x12b   :  { %484 = vrot.lane.b32.xlu1 %v1707_v28, %s1098_s23  ;;  %v703_v43 = vadd.f32 %v671_v9, %v538_v29 }
 0x12c   :  { %v455_v34 = vpop.permute.xlu0 %454  ;;  %v704_v59 = vadd.f32 %v672_v30, %v539_v33 }
 0x12d   :  { %v457_v7 = vpop.permute.xlu1 %456  ;;  %v522_v13 = vmul.f32 %v1710_v26, %v455_v34 }
 0x12e   :  { %614 = vrot.lane.b32.xlu0 %v1694_v44, %s1099_s3  ;;  %v523_v37 = vmul.f32 %v1710_v26, %v457_v7 }
 0x12f   :  { %616 = vrot.lane.b32.xlu1 %v1696_v23, %s1099_s3  ;;  %v687_v27 = vadd.f32 %v655_v16, %v522_v13 }
 0x130   :  { %v587_v38 = vpop.permute.xlu0 %586  ;;  %v688_v24 = vadd.f32 %v656_v41, %v523_v37  ;;  %v673_v41 = vmul.f32 %v1717_v60, %v1434_v50  ;;  %v657_v50 = vmul.f32 %v1717_v60, %v1444_v57 }
 0x131   :  { %v589_v10 = vpop.permute.xlu1 %588  ;;  %v638_v11 = vmul.f32 %v1721_v8, %v587_v38 }
 0x132   :  { %v639_v4 = vmul.f32 %v1721_v8, %v589_v10  ;;  %582 = vrot.lane.b32.xlu0 %v1705_v49, %s1099_s3 }
 0x133   :  { %584 = vrot.lane.b32.xlu1 %v1707_v28, %s1099_s3  ;;  %v735_v6 = vadd.f32 %v703_v43, %v638_v11  ;;  %v674_v11 = vmul.f32 %v1717_v60, %v1432_v47 }
 0x134   :  { %v736_v18 = vadd.f32 %v704_v59, %v639_v4  ;;  %v555_v21 = vpop.permute.xlu0 %554 }
 0x135   :  { %v557_v19 = vpop.permute.xlu1 %556  ;;  %v622_v53 = vmul.f32 %v1721_v8, %v555_v21  ;;  %v768_v48 = vadd.f32 %v1744_v42, %v735_v6 }
 0x136   :  { %v623_v45 = vmul.f32 %v1721_v8, %v557_v19  ;;  %v769_v51 = vadd.f32 %v1744_v42, %v736_v18 }
 0x137   :  { %v719_v7 = vadd.f32 %v687_v27, %v622_v53  ;;  %v800_v34 = vmax.f32 %v768_v48, 0.0  ;;  %v658_v27 = vmul.f32 %v1717_v60, %v1442_v56 }
 0x138   :  { %v720_v25 = vadd.f32 %v688_v24, %v623_v45  ;;  %v801_v54 = vmax.f32 %v769_v51, 0.0  ;;  %v491_v29 = vpop.permute.xlu0 %490 }
 0x139   :  { %v493_v33 = vpop.permute.xlu1 %492  ;;  %v752_v9 = vadd.f32 %v1744_v42, %v719_v7  ;;  %v540_v43 = vmul.f32 %v1710_v26, %v491_v29 }
 0x13a   :  { %v753_v52 = vadd.f32 %v1744_v42, %v720_v25  ;;  %v968_v30 = vpack.c.bf16 %v801_v54, %v800_v34  ;;  %v541_v4 = vmul.f32 %v1710_v26, %v493_v33 }
 0x13b   :  { %v784_v37 = vmax.f32 %v752_v9, 0.0  ;;  %v705_v45 = vadd.f32 %v673_v41, %v540_v43 }
 0x13c   :  { %v785_v10 = vmax.f32 %v753_v52, 0.0  ;;  %969 = vmatprep.subr.bf16.mxu0 %v968_v30  ;;  %v459_v38 = vpop.permute.xlu0 %458  ;;  %v706_v16 = vadd.f32 %v674_v11, %v541_v4 }
 0x13d   :  { %v461_v59 = vpop.permute.xlu1 %460  ;;  %v524_v21 = vmul.f32 %v1710_v26, %v459_v38 }
 0x13e   :  { %v970_v13 = vpack.c.bf16 %v785_v10, %v784_v37  ;;  %v525_v6 = vmul.f32 %v1710_v26, %v461_v59 }
 0x13f   :  { %v689_v34 = vadd.f32 %v657_v50, %v524_v21 }
 0x140   :  { %971 = vmatpush3.bf16.xpose.msra.mxu0 %v970_v13  ;;  %v591_v24 = vpop.permute.xlu0 %590  ;;  %v690_v25 = vadd.f32 %v658_v27, %v525_v6 }
 0x141   :  { %v593_v18 = vpop.permute.xlu1 %592  ;;  %v640_v51 = vmul.f32 %v1721_v8, %v591_v24  ;;  %v675_v24 = vmul.f32 %v1717_v60, %v1478_v58  ;;  %v659_v58 = vmul.f32 %v1717_v60, %v1488_v63 }
 0x142   :  { %v641_v19 = vmul.f32 %v1721_v8, %v593_v18 }
 0x143   :  { %v737_v53 = vadd.f32 %v705_v45, %v640_v51 }
 0x144   :  { %v738_v47 = vadd.f32 %v706_v16, %v641_v19  ;;  %v559_v33 = vpop.permute.xlu0 %558  ;;  %v676_v19 = vmul.f32 %v1717_v60, %v1476_v55 }
 0x145   :  { %v561_v48 = vpop.permute.xlu1 %560  ;;  %v770_v29 = vadd.f32 %v1744_v42, %v737_v53  ;;  %v624_v52 = vmul.f32 %v1721_v8, %v559_v33 }
 0x146   :  { %v771_v54 = vadd.f32 %v1744_v42, %v738_v47  ;;  %v625_v7 = vmul.f32 %v1721_v8, %v561_v48 }
 0x147   :  { %v802_v56 = vmax.f32 %v770_v29, 0.0  ;;  %v721_v10 = vadd.f32 %v689_v34, %v624_v52 }
 0x148   :  { %v803_v30 = vmax.f32 %v771_v54, 0.0  ;;  %v722_v9 = vadd.f32 %v690_v25, %v625_v7  ;;  %v495_v37 = vpop.permute.xlu0 %494  ;;  %v660_v25 = vmul.f32 %v1717_v60, %v1486_v62 }
 0x149   :  { %v497_v59 = vpop.permute.xlu1 %496  ;;  %v754_v4 = vadd.f32 %v1744_v42, %v721_v10  ;;  %v542_v16 = vmul.f32 %v1710_v26, %v495_v37 }
 0x14a   :  { %v755_v57 = vadd.f32 %v1744_v42, %v722_v9  ;;  %v972_v38 = vpack.c.bf16 %v803_v30, %v802_v56  ;;  %v543_v41 = vmul.f32 %v1710_v26, %v497_v59 }
 0x14b   :  { %v786_v13 = vmax.f32 %v754_v4, 0.0  ;;  %v707_v50 = vadd.f32 %v675_v24, %v542_v16  ;;  %v678_v24 = vmul.f32 %v1717_v60, %v1520_v61 }
 0x14c   :  { %v787_v43 = vmax.f32 %v755_v57, 0.0  ;;  %973 = vmatprep.subr.bf16.mxu0 %v972_v38  ;;  %v463_v18 = vpop.permute.xlu0 %462  ;;  %v708_v21 = vadd.f32 %v676_v19, %v543_v41 }
 0x14d   :  { %v465_v11 = vpop.permute.xlu1 %464  ;;  %v526_v53 = vmul.f32 %v1710_v26, %v463_v18 }
 0x14e   :  { %v974_v6 = vpack.c.bf16 %v787_v43, %v786_v13  ;;  %v527_v51 = vmul.f32 %v1710_v26, %v465_v11 }
 0x14f   :  { %v691_v30 = vadd.f32 %v659_v58, %v526_v53 }
 0x150   :  { %975 = vmatpush3.bf16.xpose.msra.mxu0 %v974_v6  ;;  %v595_v47 = vpop.permute.xlu0 %594  ;;  %v692_v33 = vadd.f32 %v660_v25, %v527_v51 }
 0x151   :  { %v597_v45 = vpop.permute.xlu1 %596  ;;  %v642_v48 = vmul.f32 %v1721_v8, %v595_v47 }
 0x152   :  { %v643_v27 = vmul.f32 %v1721_v8, %v597_v45  ;;  %v677_v45 = vmul.f32 %v1717_v60, %v1522_v0  ;;  %v661_v0 = vmul.f32 %v1717_v60, %v1532_v2 }
 0x153   :  { %v739_v54 = vadd.f32 %v707_v50, %v642_v48 }
 0x154   :  { %v740_v55 = vadd.f32 %v708_v21, %v643_v27  ;;  %v563_v52 = vpop.permute.xlu0 %562 }
 0x155   :  { %v565_v7 = vpop.permute.xlu1 %564  ;;  %v772_v9 = vadd.f32 %v1744_v42, %v739_v54  ;;  %v626_v56 = vmul.f32 %v1721_v8, %v563_v52 }
 0x156   :  { %v773_v34 = vadd.f32 %v1744_v42, %v740_v55  ;;  %v627_v29 = vmul.f32 %v1721_v8, %v565_v7  ;;  %v662_v55 = vmul.f32 %v1717_v60, %v1530_v12 }
 0x157   :  { %v804_v62 = vmax.f32 %v772_v9, 0.0  ;;  %v723_v57 = vadd.f32 %v691_v30, %v626_v56 }
 0x158   :  { %v805_v10 = vmax.f32 %v773_v34, 0.0  ;;  %v724_v59 = vadd.f32 %v692_v33, %v627_v29  ;;  %v499_v4 = vpop.permute.xlu0 %498 }
 0x159   :  { %v501_v37 = vpop.permute.xlu1 %500  ;;  %v756_v38 = vadd.f32 %v1744_v42, %v723_v57  ;;  %v544_v6 = vmul.f32 %v1710_v26, %v499_v4 }
 0x15a   :  { %v757_v63 = vadd.f32 %v1744_v42, %v724_v59  ;;  %v976_v43 = vpack.c.bf16 %v805_v10, %v804_v62  ;;  %v545_v18 = vmul.f32 %v1710_v26, %v501_v37 }
 0x15b   :  { %v788_v11 = vmax.f32 %v756_v38, 0.0  ;;  %v709_v53 = vadd.f32 %v677_v45, %v544_v6  ;;  %v679_v6 = vmul.f32 %v1717_v60, %v1564_v1  ;;  %v663_v1 = vmul.f32 %v1717_v60, %v1572_v5 }
 0x15c   :  { %v789_v13 = vmax.f32 %v757_v63, 0.0  ;;  %977 = vmatprep.subr.bf16.mxu0 %v976_v43  ;;  %v467_v16 = vpop.permute.xlu0 %466  ;;  %v710_v51 = vadd.f32 %v678_v24, %v545_v18 }
 0x15d   :  { %v469_v41 = vpop.permute.xlu1 %468  ;;  %v528_v48 = vmul.f32 %v1710_v26, %v467_v16  ;;  %v680_v16 = vmul.f32 %v1717_v60, %v1562_v14 }
 0x15e   :  { %v978_v19 = vpack.c.bf16 %v789_v13, %v788_v11  ;;  %v529_v27 = vmul.f32 %v1710_v26, %v469_v41 }
 0x15f   :  { %v693_v52 = vadd.f32 %v661_v0, %v528_v48 }
 0x160   :  { %979 = vmatpush3.bf16.xpose.msra.mxu0 %v978_v19  ;;  %v599_v50 = vpop.permute.xlu0 %598  ;;  %v694_v7 = vadd.f32 %v662_v55, %v529_v27 }
 0x161   :  { %v601_v21 = vpop.permute.xlu1 %600  ;;  %v644_v25 = vmul.f32 %v1721_v8, %v599_v50 }
 0x162   :  { %v645_v47 = vmul.f32 %v1721_v8, %v601_v21 }
 0x163   :  { %v741_v58 = vadd.f32 %v709_v53, %v644_v25  ;;  %v664_v53 = vmul.f32 %v1717_v60, %v1574_v15 }
 0x164   :  { %v742_v61 = vadd.f32 %v710_v51, %v645_v47  ;;  %v567_v29 = vpop.permute.xlu0 %566 }
 0x165   :  { %v569_v54 = vpop.permute.xlu1 %568  ;;  %v774_v30 = vadd.f32 %v1744_v42, %v741_v58  ;;  %v628_v9 = vmul.f32 %v1721_v8, %v567_v29 }
 0x166   :  { %v775_v33 = vadd.f32 %v1744_v42, %v742_v61  ;;  %v629_v34 = vmul.f32 %v1721_v8, %v569_v54 }
 0x167   :  { %v806_v12 = vmax.f32 %v774_v30, 0.0  ;;  %v725_v59 = vadd.f32 %v693_v52, %v628_v9 }
 0x168   :  { %v807_v56 = vmax.f32 %v775_v33, 0.0  ;;  %v726_v10 = vadd.f32 %v694_v7, %v629_v34  ;;  %v503_v57 = vpop.permute.xlu0 %502 }
 0x169   :  { %v505_v62 = vpop.permute.xlu1 %504  ;;  %v758_v37 = vadd.f32 %v1744_v42, %v725_v59  ;;  %v546_v41 = vmul.f32 %v1710_v26, %v503_v57 }
 0x16a   :  { %v759_v2 = vadd.f32 %v1744_v42, %v726_v10  ;;  %v980_v63 = vpack.c.bf16 %v807_v56, %v806_v12  ;;  %v547_v13 = vmul.f32 %v1710_v26, %v505_v62 }
 0x16b   :  { %v790_v38 = vmax.f32 %v758_v37, 0.0  ;;  %v711_v27 = vadd.f32 %v679_v6, %v546_v41 }
 0x16c   :  { %v791_v4 = vmax.f32 %v759_v2, 0.0  ;;  %981 = vmatprep.subr.bf16.mxu0 %v980_v63  ;;  %v471_v11 = vpop.permute.xlu0 %470  ;;  %v712_v24 = vadd.f32 %v680_v16, %v547_v13 }
 0x16d   :  { %v473_v43 = vpop.permute.xlu1 %472  ;;  %v530_v47 = vmul.f32 %v1710_v26, %v471_v11 }
 0x16e   :  { %v982_v18 = vpack.c.bf16 %v791_v4, %v790_v38  ;;  %v531_v45 = vmul.f32 %v1710_v26, %v473_v43  ;;  %v682_v4 = vmul.f32 %v1717_v60, %v1608_v17  ;;  %v681_v38 = vmul.f32 %v1717_v60, %v1606_v3 }
 0x16f   :  { %v695_v54 = vadd.f32 %v663_v1, %v530_v47  ;;  %v665_v3 = vmul.f32 %v1717_v60, %v1616_v20 }
 0x170   :  { %983 = vmatpush3.bf16.xpose.msra.mxu0 %v982_v18  ;;  %v603_v51 = vpop.permute.xlu0 %602  ;;  %v696_v55 = vadd.f32 %v664_v53, %v531_v45 }
 0x171   :  { %v605_v19 = vpop.permute.xlu1 %604  ;;  %v646_v50 = vmul.f32 %v1721_v8, %v603_v51 }
 0x172   :  { %v647_v21 = vmul.f32 %v1721_v8, %v605_v19 }
 0x173   :  { %v743_v48 = vadd.f32 %v711_v27, %v646_v50 }
 0x174   :  { %v744_v14 = vadd.f32 %v712_v24, %v647_v21  ;;  %v571_v58 = vpop.permute.xlu0 %570  ;;  %v666_v24 = vmul.f32 %v1717_v60, %v1618_v40 }
 0x175   :  { %v573_v25 = vpop.permute.xlu1 %572  ;;  %v776_v7 = vadd.f32 %v1744_v42, %v743_v48  ;;  %v630_v33 = vmul.f32 %v1721_v8, %v571_v58 }
 0x176   :  { %v777_v61 = vadd.f32 %v1744_v42, %v744_v14  ;;  %v631_v0 = vmul.f32 %v1721_v8, %v573_v25 }
 0x177   :  { %v808_v15 = vmax.f32 %v776_v7, 0.0  ;;  %v727_v52 = vadd.f32 %v695_v54, %v630_v33 }
 0x178   :  { %v809_v34 = vmax.f32 %v777_v61, 0.0  ;;  %v728_v29 = vadd.f32 %v696_v55, %v631_v0  ;;  %v507_v9 = vpop.permute.xlu0 %506 }
 0x179   :  { %v509_v30 = vpop.permute.xlu1 %508  ;;  %v760_v56 = vadd.f32 %v1744_v42, %v727_v52  ;;  %v548_v37 = vmul.f32 %v1710_v26, %v507_v9  ;;  %v683_v9 = vmul.f32 %v1717_v60, %v1650_v35  ;;  %v667_v35 = vmul.f32 %v1717_v60, %v1660_v22 }
 0x17a   :  { %v761_v5 = vadd.f32 %v1744_v42, %v728_v29  ;;  %v984_v10 = vpack.c.bf16 %v809_v34, %v808_v15  ;;  %v549_v2 = vmul.f32 %v1710_v26, %v509_v30 }
 0x17b   :  { %v792_v59 = vmax.f32 %v760_v56, 0.0  ;;  %v713_v16 = vadd.f32 %v681_v38, %v548_v37 }
 0x17c   :  { %v793_v12 = vmax.f32 %v761_v5, 0.0  ;;  %985 = vmatprep.subr.bf16.mxu0 %v984_v10  ;;  %v475_v57 = vpop.permute.xlu0 %474  ;;  %v714_v13 = vadd.f32 %v682_v4, %v549_v2  ;;  %v684_v5 = vmul.f32 %v1717_v60, %v1652_v39 }
 0x17d   :  { %v477_v62 = vpop.permute.xlu1 %476  ;;  %v532_v6 = vmul.f32 %v1710_v26, %v475_v57 }
 0x17e   :  { %v986_v63 = vpack.c.bf16 %v793_v12, %v792_v59  ;;  %v533_v11 = vmul.f32 %v1710_v26, %v477_v62 }
 0x17f   :  { %v697_v53 = vadd.f32 %v665_v3, %v532_v6 }
 0x180   :  { %987 = vmatpush3.bf16.xpose.msra.mxu0 %v986_v63  ;;  %v607_v18 = vpop.permute.xlu0 %606  ;;  %v698_v51 = vadd.f32 %v666_v24, %v533_v11  ;;  %v668_v63 = vmul.f32 %v1717_v60, %v1662_v46 }
 0x181   :  { %v609_v43 = vpop.permute.xlu1 %608  ;;  %v648_v19 = vmul.f32 %v1721_v8, %v607_v18 }
 0x182   :  { %v649_v41 = vmul.f32 %v1721_v8, %v609_v43 }
 0x183   :  { %v745_v45 = vadd.f32 %v713_v16, %v648_v19 }
 0x184   :  { %v746_v17 = vadd.f32 %v714_v13, %v649_v41  ;;  %v575_v50 = vpop.permute.xlu0 %574 }
 0x185   :  { %v577_v21 = vpop.permute.xlu1 %576  ;;  %v778_v14 = vadd.f32 %v1744_v42, %v745_v45  ;;  %v632_v1 = vmul.f32 %v1721_v8, %v575_v50 }
 0x186   :  { %v779_v27 = vadd.f32 %v1744_v42, %v746_v17  ;;  %v633_v47 = vmul.f32 %v1721_v8, %v577_v21 }
 0x187   :  { %v810_v40 = vmax.f32 %v778_v14, 0.0  ;;  %v729_v55 = vadd.f32 %v697_v53, %v632_v1 }
 0x188   :  { %v811_v48 = vmax.f32 %v779_v27, 0.0  ;;  %v730_v25 = vadd.f32 %v698_v51, %v633_v47  ;;  %v511_v0 = vpop.permute.xlu0 %510 }
 0x189   :  { %v513_v61 = vpop.permute.xlu1 %512  ;;  %v762_v58 = vadd.f32 %v1744_v42, %v729_v55  ;;  %v550_v52 = vmul.f32 %v1710_v26, %v511_v0 }
 0x18a   :  { %v763_v20 = vadd.f32 %v1744_v42, %v730_v25  ;;  %v988_v54 = vpack.c.bf16 %v811_v48, %v810_v40  ;;  %v551_v29 = vmul.f32 %v1710_v26, %v513_v61  ;;  %v686_v25 = vmul.f32 %v1717_v60, %v1696_v23 }
 0x18b   :  { %v794_v33 = vmax.f32 %v762_v58, 0.0  ;;  %v715_v2 = vadd.f32 %v683_v9, %v550_v52  ;;  %v685_v40 = vmul.f32 %v1717_v60, %v1694_v44  ;;  %v669_v44 = vmul.f32 %v1717_v60, %v1705_v49 }
 0x18c   :  { %v795_v7 = vmax.f32 %v763_v20, 0.0  ;;  %989 = vmatprep.subr.bf16.mxu0 %v988_v54  ;;  %v479_v15 = vpop.permute.xlu0 %478  ;;  %v716_v10 = vadd.f32 %v684_v5, %v551_v29 }
 0x18d   :  { %v481_v34 = vpop.permute.xlu1 %480  ;;  %v534_v57 = vmul.f32 %v1710_v26, %v479_v15 }
 0x18e   :  { %v990_v30 = vpack.c.bf16 %v795_v7, %v794_v33  ;;  %v535_v12 = vmul.f32 %v1710_v26, %v481_v34  ;;  %v670_v34 = vmul.f32 %v1717_v60, %v1707_v28 }
 0x18f   :  { %v699_v18 = vadd.f32 %v667_v35, %v534_v57 }
 0x190   :  { %991 = vmatpush3.bf16.xpose.msra.mxu0 %v990_v30  ;;  %v611_v62 = vpop.permute.xlu0 %610  ;;  %v700_v43 = vadd.f32 %v668_v63, %v535_v12 }
 0x191   :  { %v613_v56 = vpop.permute.xlu1 %612  ;;  %v650_v37 = vmul.f32 %v1721_v8, %v611_v62 }
 0x192   :  { %v651_v59 = vmul.f32 %v1721_v8, %v613_v56 }
 0x193   :  { %v747_v4 = vadd.f32 %v715_v2, %v650_v37 }
 0x194   :  { %v748_v39 = vadd.f32 %v716_v10, %v651_v59  ;;  %v579_v41 = vpop.permute.xlu0 %578 }
 0x195   :  { %v581_v38 = vpop.permute.xlu1 %580  ;;  %v780_v16 = vadd.f32 %v1744_v42, %v747_v4  ;;  %v634_v6 = vmul.f32 %v1721_v8, %v579_v41 }
 0x196   :  { %v781_v13 = vadd.f32 %v1744_v42, %v748_v39  ;;  %v635_v11 = vmul.f32 %v1721_v8, %v581_v38  ;;  %v1100_v39 = vmov 1966171168  }
 0x197   :  { %v812_v46 = vmax.f32 %v780_v16, 0.0  ;;  %v731_v17 = vadd.f32 %v699_v18, %v634_v6  ;;  %v894_v35 = vunpack.c.l.s4 %v1100_v39 }
 0x198   :  { %v813_v19 = vmax.f32 %v781_v13, 0.0  ;;  %v732_v24 = vadd.f32 %v700_v43, %v635_v11  ;;  %v515_v45 = vpop.permute.xlu0 %514 }
 0x199   :  { %v517_v3 = vpop.permute.xlu1 %516  ;;  %v764_v21 = vadd.f32 %v1744_v42, %v731_v17  ;;  %v552_v1 = vmul.f32 %v1710_v26, %v515_v45  ;;  %v895_v4 = vunpack.c.0.s8 %v894_v35 }
 0x19a   :  { %v765_v22 = vadd.f32 %v1744_v42, %v732_v24  ;;  %v992_v51 = vpack.c.bf16 %v813_v19, %v812_v46  ;;  %v553_v53 = vmul.f32 %v1710_v26, %v517_v3 }
 0x19b   :  { %v796_v47 = vmax.f32 %v764_v21, 0.0  ;;  %v717_v54 = vadd.f32 %v685_v40, %v552_v1  ;;  %v898_v41 = vsub.s32 %v895_v4, %v1328_v32 }
 0x19c   :  { %v797_v27 = vmax.f32 %v765_v22, 0.0  ;;  %993 = vmatprep.subr.bf16.mxu0 %v992_v51  ;;  %v483_v14 = vpop.permute.xlu0 %482  ;;  %v718_v61 = vadd.f32 %v686_v25, %v553_v53 }
 0x19d   :  { %v485_v50 = vpop.permute.xlu1 %484  ;;  %v536_v7 = vmul.f32 %v1710_v26, %v483_v14 }
 0x19e   :  { %v994_v48 = vpack.c.bf16 %v797_v27, %v796_v47  ;;  %v537_v20 = vmul.f32 %v1710_v26, %v485_v50 }
 0x19f   :  { %v701_v56 = vadd.f32 %v669_v44, %v536_v7 }
 0x1a0   :  { %995 = vmatpush3.bf16.xpose.msra.mxu0 %v994_v48  ;;  %v615_v58 = vpop.permute.xlu0 %614  ;;  %v702_v52 = vadd.f32 %v670_v34, %v537_v20 }
 0x1a1   :  { %v617_v55 = vpop.permute.xlu1 %616  ;;  %v652_v33 = vmul.f32 %v1721_v8, %v615_v58 }
 0x1a2   :  { %v653_v0 = vmul.f32 %v1721_v8, %v617_v55 }
 0x1a3   :  { %v749_v29 = vadd.f32 %v717_v54, %v652_v33 }
 0x1a4   :  { %v750_v23 = vadd.f32 %v718_v61, %v653_v0  ;;  %v583_v9 = vpop.permute.xlu0 %582 }
 0x1a5   :  { %v585_v15 = vpop.permute.xlu1 %584  ;;  %v782_v26 = vadd.f32 %v1744_v42, %v749_v29  ;;  %v636_v10 = vmul.f32 %v1721_v8, %v583_v9 }
 0x1a6   :  { %v783_v30 = vadd.f32 %v1744_v42, %v750_v23  ;;  %v637_v5 = vmul.f32 %v1721_v8, %v585_v15  ;;  %v818_v8 = vstv %s933_s2 }
 0x1a7   :  { %v814_v28 = vmax.f32 %v782_v26, 0.0  ;;  %v733_v62 = vadd.f32 %v701_v56, %v636_v10 }
 0x1a8   :  { %v815_v12 = vmax.f32 %v783_v30, 0.0  ;;  %v734_v59 = vadd.f32 %v702_v52, %v637_v5 }
 0x1a9   :  { %v766_v49 = vadd.f32 %v1744_v42, %v733_v62 }
 0x1aa   :  { %v767_v2 = vadd.f32 %v1744_v42, %v734_v59  ;;  %v996_v60 = vpack.c.bf16 %v815_v12, %v814_v28 }
 0x1ab   :  { %v798_v37 = vmax.f32 %v766_v49, 0.0 }
 0x1ac   :  { %v799_v57 = vmax.f32 %v767_v2, 0.0  ;;  %997 = vmatprep.subr.bf16.mxu0 %v996_v60 }
 0x1ae   :  { %v998_v63 = vpack.c.bf16 %v799_v57, %v798_v37 }
 0x1b0   :  { %999 = vmatpush3.bf16.xpose.msra.mxu0 %v998_v63 }
 0x1b7   :  { %967 = vmatmul.mubr.f32.vlgmr.msra.gmra.mrb[0].mxu0 %v1735_v36 }
 0x28a   :  { %v885_v38 = vpop.f32.mrb[0].mxu0 }
 0x28b   :  { %v886_v43 = vadd.f32 %v885_v38, %v818_v8  ;;  %v887_v13 = vpop.f32.mrb[1].mxu0 }
 0x28c   :  { %v888_v11 = vadd.f32 %v887_v13, %v818_v8 }
 0x28e   :  { %v892_v42 = vcombine.low %v886_v43, %v888_v11 }
 0x290   :  { %v899_v18 = vrot.slane %v892_v42, %v898_v41 }
 0x292   :  { %v906_v16 = vrot.slane %v899_v18, %v898_v41 }
 0x294   :  { %912 = vst.msk [vmem:[#allocation9] sm:$0x3] %vm910_vm0, %v906_v16 }
 0x295   :  { %1074 = shalt.err (!%p1071_p9)
}
 0x296   :  { %s1075_s9 = scalar_lea.hbm %s1917_s4, 32 }
 0x297   :  { %p1076_p10 = scmp.ne.s32.totalorder %s1917_s4, %s1075_s9  ;;  %p1079_p11 = scmp.lt.u32.totalorder %s1075_s9, %s1917_s4 }
 0x299   :  { %p1081_p12 = pnand %p1079_p11, %p1076_p10 }
 0x29b   :  { %1084 = shalt.err (!%p1081_p12)
}
 0x29c   :  { %922 = dma.vmem_to_hbm [thread:$0]  %s920_s5, 32, %s1917_s4, [#allocation4]  }
 0x29d   :  { %1091 = dma.done.wait [#allocation4], 32  }
 0x29e   :  { %1092 = vsyncadd [#allocation4], 4294967264 }
 0x29f   :  { %926 = vsyncpa [#allocation3], 1 }
 0x2a0   :  { %927 = vsyncpa [#allocation8], 1 }
 0x2a1   :  { %928 = vsyncpa [#allocation4], 1 }
 0x2a2   :  { %929 = vsyncpa [#allocation5], 1 }

</bundles_post_ra>
